<compile_context>
chip_gen: v6e
topology: v6e:2x2x1
jax: 0.10.0
libtpu: 0.0.40
codegen_flags: <defaults>
</compile_context>

<pallas_src>
import functools
import math

import jax
import jax.numpy as jnp
from jax import lax
from jax.experimental import pallas as pl
from jax.experimental.pallas import tpu as pltpu


_VMEM_BUDGET = 24 * 1024 * 1024  # v7x-safe (64 MiB physical, ~32 MiB scoped default)


def _round_up(x, m):
    return ((x + m - 1) // m) * m


def _sublane_multiple(dtype):
    """Sublane packing granularity: 8 for 32-bit, 16 for 16-bit, 32 for 8-bit."""
    itemsize = jnp.dtype(dtype).itemsize
    if itemsize >= 4:
        return 8
    if itemsize == 2:
        return 16
    return 32


def _pick_seq_tile(n, target, sublane):
    """Pick a sublane-multiple tile <= target.  Never returns the raw extent for
    awkward n; the caller pads the sequence up to a tile multiple instead."""
    if n <= target:
        return _round_up(max(n, 1), sublane)
    # Prefer a divisor tile (no padding) down to half the target.
    hi = target - target % sublane
    lo = max(target // 2, sublane)
    for t in range(hi, lo - 1, -sublane):
        if n % t == 0:
            return t
    return max(hi, sublane)


def _vmem_estimate(hb, tq, tk, D, in_bytes, comp_bytes):
    """Rough per-call VMEM footprint: double-buffered q/k/v/o blocks + scratch
    (m, l, acc, scaled-q) + f32 score/prob temporaries (the growing terms)."""
    blocks = 2 * hb * (2 * tq + 2 * tk) * D * in_bytes          # q,o,k,v x2 buffers
    scratch = hb * tq * (2 * 4 + 4 * D) + hb * tq * D * comp_bytes
    temps = hb * tq * tk * (4 + 4)                               # s + p (worst case)
    return blocks + scratch + temps


def _pick_heads_per_block(bh, tq, tk, D, in_bytes, comp_bytes):
    """Fuse heads only when per-head tiles are genuinely tiny (amortize the
    ~0.35us per-grid-step overhead).  Once tq/tk reach 128 the MXU/pipeline is
    already well fed and fusion would just batch tiny matmuls and grow VMEM."""
    if tq >= 128 or tk >= 128:
        return 1
    best = 1
    for cand in range(2, bh + 1):
        if bh % cand:
            continue
        if cand * max(tq, tk) > 512:     # keep the fused block modest
            continue
        if _vmem_estimate(cand, tq, tk, D, in_bytes, comp_bytes) > _VMEM_BUDGET:
            continue
        best = cand
    return best


def _flash_sdpa_kernel(q_ref, k_ref, v_ref, o_ref, m_sc, l_sc, acc_sc, qs_sc, *,
                       scale, kv_valid, compute_dtype, exp_in_bf16):
    """One (head-block, q-tile, kv-tile) flash-attention step.

    Blocks are (tq, D)/(tk, D) when the head dim is squeezed (hb == 1), or
    (hb, tq, D)/(hb, tk, D) otherwise.  Scratch (resident across the kv axis):
      m_sc   : running row max               (f32)
      l_sc   : running softmax denominator   (f32)
      acc_sc : running weighted-V accumulator(f32)
      qs_sc  : pre-scaled (and dtype-cast) q (compute dtype)
    """
    kv = pl.program_id(2)
    batched = q_ref.ndim == 3

    @pl.when(kv == 0)
    def _():
        m_sc[...] = jnp.full_like(m_sc, -jnp.inf)
        l_sc[...] = jnp.zeros_like(l_sc)
        acc_sc[...] = jnp.zeros_like(acc_sc)
        # q is block-resident across the kv axis: fold 1/sqrt(d_k) (and optional
        # downcast) in once per q tile instead of every kv step.
        qs_sc[...] = (q_ref[...] * jnp.asarray(scale, dtype=q_ref.dtype)).astype(qs_sc.dtype)

    q = qs_sc[...]
    k = k_ref[...]
    if k.dtype != compute_dtype:
        k = k.astype(compute_dtype)
    v = v_ref[...]
    if v.dtype != compute_dtype:
        v = v.astype(compute_dtype)

    # Scores: contraction on the last dim of both operands, so the K "transpose"
    # is absorbed into the MXU operand feed (no XLU transpose); f32 accumulation.
    if batched:
        s = jnp.einsum("hqd,hkd->hqk", q, k, preferred_element_type=jnp.float32)
    else:
        s = jnp.einsum("qd,kd->qk", q, k, preferred_element_type=jnp.float32)

    # Mask kv-side padding with -inf BEFORE the running max (only present when
    # S_kv was padded up to a tile multiple).
    if kv_valid is not None:
        tk = k_ref.shape[-2]
        col = kv * tk + lax.broadcasted_iota(jnp.int32, s.shape, s.ndim - 1)
        s = jnp.where(col < kv_valid, s, -jnp.inf)

    # Online (numerically stable) softmax update.
    m_prev = m_sc[...]
    m_new = jnp.maximum(m_prev, jnp.max(s, axis=-1, keepdims=True))
    alpha = jnp.exp(m_prev - m_new)

    if exp_in_bf16:
        # bf16 EUP path: relieves the single EUP slot on v6e/v7x and yields p
        # already in the MXU operand dtype (no separate full-tile cast).
        p = jnp.exp((s - m_new).astype(jnp.bfloat16))
    else:
        p = jnp.exp(s - m_new)

    l_sc[...] = alpha * l_sc[...] + jnp.sum(p, axis=-1, keepdims=True,
                                            dtype=jnp.float32)

    pv = p if p.dtype == v.dtype else p.astype(v.dtype)
    if batched:
        upd = jnp.einsum("hqk,hkd->hqd", pv, v, preferred_element_type=jnp.float32)
    else:
        upd = jnp.einsum("qk,kd->qd", pv, v, preferred_element_type=jnp.float32)
    acc_sc[...] = alpha * acc_sc[...] + upd
    m_sc[...] = m_new

    @pl.when(kv == pl.num_programs(2) - 1)
    def _():
        # Exact reciprocal: it acts once on a tiny (tq, 1) vector, so accuracy
        # is essentially free compared to the approx EUP path.
        inv_l = pl.reciprocal(l_sc[...], approx=False)
        o_ref[...] = (acc_sc[...] * inv_l).astype(o_ref.dtype)


def scaled_dot_product_attention(query, key, value, mask=None, temperature=1.0, *,
                                 q_tile=512, kv_tile=512, compute_dtype=None):
    """Pallas implementation of ScaledDotProductAttention.forward (mask=None).

    query: (..., S, D); key/value: (..., S_kv, D).
    `temperature` is stored-but-unused by the reference module's forward(), which
    always divides by sqrt(d_k); mirrored here.
    `compute_dtype=jnp.bfloat16` optionally downcasts the matmul operands for f32
    callers on v6e/v7x (accuracy-affecting; off by default).
    """
    # TODO(synk): mask != None (masked_fill(mask == 0, -inf)) is not wired into the
    # kernel; it needs an additive -inf bias on the score tile before the running
    # max plus an all-masked-row guard on the denominator.
    assert mask is None, "mask path not implemented in the Pallas kernel"
    del temperature  # unused by the reference module's forward math

    *lead, S, D = query.shape
    S_kv = key.shape[-2]
    assert key.shape[-1] == D and value.shape[-1] == D and value.shape[-2] == S_kv

    BH = 1
    for d in lead:
        BH *= d

    in_dtype = jnp.dtype(query.dtype)
    comp_dtype = jnp.dtype(compute_dtype) if compute_dtype is not None else in_dtype
    sub = _sublane_multiple(in_dtype)

    # Dtype-aware tile selection, then shrink until the VMEM estimate fits the
    # v7x-safe budget (blocks + scratch + f32 score/prob temporaries).
    tq = _pick_seq_tile(S, q_tile, sub)
    tk = _pick_seq_tile(S_kv, kv_tile, sub)
    while (_vmem_estimate(1, tq, tk, D, in_dtype.itemsize, comp_dtype.itemsize)
           > _VMEM_BUDGET) and (tq > sub or tk > sub):
        if tk >= tq and tk > sub:
            tk = max(sub, (tk // 2) // sub * sub)
        else:
            tq = max(sub, (tq // 2) // sub * sub)
    Sq_pad = _round_up(S, tq)
    Skv_pad = _round_up(S_kv, tk)

    hb = _pick_heads_per_block(BH, tq, tk, D, in_dtype.itemsize, comp_dtype.itemsize)

    q3 = query.reshape(BH, S, D)
    k3 = key.reshape(BH, S_kv, D)
    v3 = value.reshape(BH, S_kv, D)
    if Sq_pad != S:
        q3 = jnp.pad(q3, ((0, 0), (0, Sq_pad - S), (0, 0)))
    if Skv_pad != S_kv:
        k3 = jnp.pad(k3, ((0, 0), (0, Skv_pad - S_kv), (0, 0)))
        v3 = jnp.pad(v3, ((0, 0), (0, Skv_pad - S_kv), (0, 0)))

    kv_valid = S_kv if Skv_pad != S_kv else None
    # bf16 exp path when the PV matmul operand is bf16 anyway (v6e/v7x EUP relief;
    # v5e just upconverts internally - still correct).
    exp_in_bf16 = (comp_dtype == jnp.bfloat16) or (jnp.dtype(value.dtype) == jnp.bfloat16)

    scale = 1.0 / math.sqrt(D)
    grid = (BH // hb, Sq_pad // tq, Skv_pad // tk)

    if hb == 1:
        # Squeeze the head dim: kernel sees 2-D (tq, D)/(tk, D) tiles, so the
        # einsums lower as plain 2-D MXU matmuls with lane-dense output stores.
        q_spec = pl.BlockSpec((None, tq, D), lambda b, qi, ki: (b, qi, 0))
        k_spec = pl.BlockSpec((None, tk, D), lambda b, qi, ki: (b, ki, 0))
        v_spec = pl.BlockSpec((None, tk, D), lambda b, qi, ki: (b, ki, 0))
        o_spec = pl.BlockSpec((None, tq, D), lambda b, qi, ki: (b, qi, 0))
        scratch = [
            pltpu.VMEM((tq, 1), jnp.float32),   # running max
            pltpu.VMEM((tq, 1), jnp.float32),   # running denom
            pltpu.VMEM((tq, D), jnp.float32),   # output accumulator
            pltpu.VMEM((tq, D), comp_dtype),    # pre-scaled q
        ]
    else:
        q_spec = pl.BlockSpec((hb, tq, D), lambda b, qi, ki: (b, qi, 0))
        k_spec = pl.BlockSpec((hb, tk, D), lambda b, qi, ki: (b, ki, 0))
        v_spec = pl.BlockSpec((hb, tk, D), lambda b, qi, ki: (b, ki, 0))
        o_spec = pl.BlockSpec((hb, tq, D), lambda b, qi, ki: (b, qi, 0))
        scratch = [
            pltpu.VMEM((hb, tq, 1), jnp.float32),
            pltpu.VMEM((hb, tq, 1), jnp.float32),
            pltpu.VMEM((hb, tq, D), jnp.float32),
            pltpu.VMEM((hb, tq, D), comp_dtype),
        ]

    itemsize = in_dtype.itemsize
    num_q_tiles = Sq_pad // tq
    cost = pl.CostEstimate(
        flops=4 * BH * S * S_kv * D,                 # two matmuls
        transcendentals=BH * S * S_kv,               # exp per score element
        # K/V are re-streamed once per q tile; q and the output are read/written once.
        bytes_accessed=int((q3.size + BH * Sq_pad * D
                            + num_q_tiles * (k3.size + v3.size)) * itemsize),
    )

    est = _vmem_estimate(hb, tq, tk, D, itemsize, comp_dtype.itemsize)
    vmem_limit = int(min(48 * 1024 * 1024, max(32 * 1024 * 1024, 2 * est)))

    kernel = functools.partial(
        _flash_sdpa_kernel,
        scale=scale,
        kv_valid=kv_valid,
        compute_dtype=comp_dtype,
        exp_in_bf16=exp_in_bf16,
    )

    out = pl.pallas_call(
        kernel,
        out_shape=jax.ShapeDtypeStruct((BH, Sq_pad, D), query.dtype),
        grid_spec=pltpu.PrefetchScalarGridSpec(
            num_scalar_prefetch=0,
            grid=grid,
            in_specs=[q_spec, k_spec, v_spec],
            out_specs=o_spec,
            scratch_shapes=scratch,
        ),
        compiler_params=pltpu.CompilerParams(
            # kv (reduction) axis is last and 'arbitrary'; head/q-tile axes are
            # 'parallel' so v7x can shard them across its two TensorCores.
            dimension_semantics=("parallel", "parallel", "arbitrary"),
            vmem_limit_bytes=vmem_limit,
        ),
        cost_estimate=cost,
    )(q3, k3, v3)

    if Sq_pad != S:
        out = out[:, :S, :]
    return out.reshape(*lead, S, D)


def _reference_sdpa(query, key, value):
    q = query.astype(jnp.float32)
    k = key.astype(jnp.float32)
    v = value.astype(jnp.float32)
    d_k = q.shape[-1]
    s = jnp.matmul(q, jnp.swapaxes(k, -1, -2)) / jnp.sqrt(jnp.float32(d_k))
    w = jax.nn.softmax(s, axis=-1)
    return jnp.matmul(w, v)


if __name__ == "__main__":
    root = jax.random.PRNGKey(0)

    # Case 1: small f32, multi-head -> exercises the fused-head (3-D block) path.
    B, H, S, D = 2, 2, 8, 32
    kq, kk, kv_ = jax.random.split(root, 3)
    q = jax.random.normal(kq, (B, H, S, D), dtype=jnp.float32)
    k = jax.random.normal(kk, (B, H, S, D), dtype=jnp.float32)
    v = jax.random.normal(kv_, (B, H, S, D), dtype=jnp.float32)

    out = jax.block_until_ready(scaled_dot_product_attention(q, k, v))
    ref = _reference_sdpa(q, k, v)
    assert out.shape == (B, H, S, D)
    assert jnp.allclose(out, ref, atol=1e-4, rtol=1e-4), "f32 mismatch vs reference"

    # Case 2: bf16, single head, non-tile-multiple sequence -> exercises the
    # squeezed 2-D path, kv-padding mask, and the bf16 exp path.
    S2, D2 = 200, 64
    kq2, kk2, kv2 = jax.random.split(jax.random.fold_in(root, 1), 3)
    q2 = jax.random.normal(kq2, (1, 1, S2, D2), dtype=jnp.bfloat16)
    k2 = jax.random.normal(kk2, (1, 1, S2, D2), dtype=jnp.bfloat16)
    v2 = jax.random.normal(kv2, (1, 1, S2, D2), dtype=jnp.bfloat16)

    out2 = jax.block_until_ready(scaled_dot_product_attention(q2, k2, v2))
    ref2 = _reference_sdpa(q2, k2, v2)
    assert out2.shape == (1, 1, S2, D2)
    assert jnp.allclose(out2.astype(jnp.float32), ref2, atol=5e-2, rtol=5e-2), \
        "bf16 mismatch vs reference"

    print("KERNEL_OK")
</pallas_src>

<mosaic_0001>
module attributes {stable_mosaic.version = 11 : i64} {
  func.func @_flash_sdpa_kernel(%arg0: i32, %arg1: i32, %arg2: i32, %arg3: memref<4x8x32xf32, #tpu.memory_space<vmem>>, %arg4: memref<4x8x32xf32, #tpu.memory_space<vmem>>, %arg5: memref<4x8x32xf32, #tpu.memory_space<vmem>>, %arg6: memref<4x8x32xf32, #tpu.memory_space<vmem>>, %arg7: memref<4x8x1xf32, #tpu.memory_space<vmem>>, %arg8: memref<4x8x1xf32, #tpu.memory_space<vmem>>, %arg9: memref<4x8x32xf32, #tpu.memory_space<vmem>>, %arg10: memref<4x8x32xf32, #tpu.memory_space<vmem>>) attributes {dimension_semantics = [#tpu.dimension_semantics<parallel>, #tpu.dimension_semantics<parallel>, #tpu.dimension_semantics<arbitrary>], iteration_bounds = array<i64: 1, 1, 1>, scalar_prefetch = 0 : i64, scratch_operands = 4 : i64, tpu.core_type = #tpu.core_type<tc>, window_params = [{transform_indices = @transform_0, window_bounds = array<i64: 4, 8, 32>}, {transform_indices = @transform_1, window_bounds = array<i64: 4, 8, 32>}, {transform_indices = @transform_2, window_bounds = array<i64: 4, 8, 32>}, {transform_indices = @transform_3, window_bounds = array<i64: 4, 8, 32>}]} {
    %c0_i32 = arith.constant 0 : i32
    %0 = arith.cmpi eq, %arg2, %c0_i32 : i32
    %1 = arith.extui %0 : i1 to i32
    %c0_i32_0 = arith.constant 0 : i32
    %2 = arith.cmpi ne, %1, %c0_i32_0 : i32
    scf.if %2 {
      %cst_32 = arith.constant 0xFF800000 : f32
      %32 = vector.broadcast %cst_32 : f32 to vector<4x8x1xf32>
      %c0_33 = arith.constant 0 : index
      %c0_34 = arith.constant 0 : index
      %c0_35 = arith.constant 0 : index
      %33 = vector.load %arg7[%c0_33, %c0_34, %c0_35] : memref<4x8x1xf32, #tpu.memory_space<vmem>>, vector<4x8x1xf32>
      tpu.vector_store %arg7[%c0_33, %c0_34, %c0_35], %32 {strides = array<i32>} : memref<4x8x1xf32, #tpu.memory_space<vmem>>, vector<4x8x1xf32>,
      %cst_36 = arith.constant 0.000000e+00 : f32
      %34 = vector.broadcast %cst_36 : f32 to vector<4x8x1xf32>
      %c0_37 = arith.constant 0 : index
      %c0_38 = arith.constant 0 : index
      %c0_39 = arith.constant 0 : index
      %35 = vector.load %arg8[%c0_37, %c0_38, %c0_39] : memref<4x8x1xf32, #tpu.memory_space<vmem>>, vector<4x8x1xf32>
      tpu.vector_store %arg8[%c0_37, %c0_38, %c0_39], %34 {strides = array<i32>} : memref<4x8x1xf32, #tpu.memory_space<vmem>>, vector<4x8x1xf32>,
      %cst_40 = arith.constant 0.000000e+00 : f32
      %36 = vector.broadcast %cst_40 : f32 to vector<4x8x32xf32>
      %c0_41 = arith.constant 0 : index
      %c0_42 = arith.constant 0 : index
      %c0_43 = arith.constant 0 : index
      %37 = vector.load %arg9[%c0_41, %c0_42, %c0_43] : memref<4x8x32xf32, #tpu.memory_space<vmem>>, vector<4x8x32xf32>
      tpu.vector_store %arg9[%c0_41, %c0_42, %c0_43], %36 {strides = array<i32>} : memref<4x8x32xf32, #tpu.memory_space<vmem>>, vector<4x8x32xf32>,
      %c0_44 = arith.constant 0 : index
      %c0_45 = arith.constant 0 : index
      %c0_46 = arith.constant 0 : index
      %38 = vector.load %arg3[%c0_44, %c0_45, %c0_46] : memref<4x8x32xf32, #tpu.memory_space<vmem>>, vector<4x8x32xf32>
      %cst_47 = arith.constant 0.176776692 : f32
      %39 = vector.broadcast %cst_47 : f32 to vector<4x8x32xf32>
      %40 = arith.mulf %38, %39 : vector<4x8x32xf32>
      %c0_48 = arith.constant 0 : index
      %c0_49 = arith.constant 0 : index
      %c0_50 = arith.constant 0 : index
      %41 = vector.load %arg10[%c0_48, %c0_49, %c0_50] : memref<4x8x32xf32, #tpu.memory_space<vmem>>, vector<4x8x32xf32>
      tpu.vector_store %arg10[%c0_48, %c0_49, %c0_50], %40 {strides = array<i32>} : memref<4x8x32xf32, #tpu.memory_space<vmem>>, vector<4x8x32xf32>,
    } else {
    }
    %c0 = arith.constant 0 : index
    %c0_1 = arith.constant 0 : index
    %c0_2 = arith.constant 0 : index
    %3 = vector.load %arg10[%c0, %c0_1, %c0_2] : memref<4x8x32xf32, #tpu.memory_space<vmem>>, vector<4x8x32xf32>
    %c0_3 = arith.constant 0 : index
    %c0_4 = arith.constant 0 : index
    %c0_5 = arith.constant 0 : index
    %4 = vector.load %arg4[%c0_3, %c0_4, %c0_5] : memref<4x8x32xf32, #tpu.memory_space<vmem>>, vector<4x8x32xf32>
    %c0_6 = arith.constant 0 : index
    %c0_7 = arith.constant 0 : index
    %c0_8 = arith.constant 0 : index
    %5 = vector.load %arg5[%c0_6, %c0_7, %c0_8] : memref<4x8x32xf32, #tpu.memory_space<vmem>>, vector<4x8x32xf32>
    "tpu.trace_start"() <{level = 10 : i32, message = "hqd,hkd->hqk"}> : () -> ()
    %cst = arith.constant dense<0.000000e+00> : vector<4x8x8xf32>
    %6 = tpu.matmul %3, %4, %cst {dimension_numbers = #tpu.dot_dimension_numbers<[2], [2], [1], [1], [0, 0, 0, 1, 1, 1], [0], [0]>} : vector<4x8x32xf32>, vector<4x8x32xf32>, vector<4x8x8xf32> -> vector<4x8x8xf32>
    "tpu.trace_stop"() : () -> ()
    %c0_9 = arith.constant 0 : index
    %c0_10 = arith.constant 0 : index
    %c0_11 = arith.constant 0 : index
    %7 = vector.load %arg7[%c0_9, %c0_10, %c0_11] : memref<4x8x1xf32, #tpu.memory_space<vmem>>, vector<4x8x1xf32>
    %cst_12 = arith.constant dense<0xFF800000> : vector<4x8xf32>
    %8 = vector.multi_reduction <maximumf>, %6, %cst_12 [2] : vector<4x8x8xf32> to vector<4x8xf32>
    %9 = vector.shape_cast %8 : vector<4x8xf32> to vector<4x8x1xf32>
    %10 = arith.maximumf %7, %9 : vector<4x8x1xf32>
    %11 = arith.subf %7, %10 : vector<4x8x1xf32>
    %12 = math.exp %11 : vector<4x8x1xf32>
    %13 = vector.broadcast %10 : vector<4x8x1xf32> to vector<4x8x8xf32>
    %14 = arith.subf %6, %13 : vector<4x8x8xf32>
    %15 = math.exp %14 : vector<4x8x8xf32>
    %c0_13 = arith.constant 0 : index
    %c0_14 = arith.constant 0 : index
    %c0_15 = arith.constant 0 : index
    %16 = vector.load %arg8[%c0_13, %c0_14, %c0_15] : memref<4x8x1xf32, #tpu.memory_space<vmem>>, vector<4x8x1xf32>
    %17 = arith.mulf %12, %16 : vector<4x8x1xf32>
    %cst_16 = arith.constant dense<0.000000e+00> : vector<4x8xf32>
    %18 = vector.multi_reduction <add>, %15, %cst_16 [2] : vector<4x8x8xf32> to vector<4x8xf32>
    %19 = vector.shape_cast %18 : vector<4x8xf32> to vector<4x8x1xf32>
    %20 = arith.addf %17, %19 : vector<4x8x1xf32>
    %c0_17 = arith.constant 0 : index
    %c0_18 = arith.constant 0 : index
    %c0_19 = arith.constant 0 : index
    %21 = vector.load %arg8[%c0_17, %c0_18, %c0_19] : memref<4x8x1xf32, #tpu.memory_space<vmem>>, vector<4x8x1xf32>
    tpu.vector_store %arg8[%c0_17, %c0_18, %c0_19], %20 {strides = array<i32>} : memref<4x8x1xf32, #tpu.memory_space<vmem>>, vector<4x8x1xf32>,
    "tpu.trace_start"() <{level = 10 : i32, message = "hqk,hkd->hqd"}> : () -> ()
    %cst_20 = arith.constant dense<0.000000e+00> : vector<4x8x32xf32>
    %22 = tpu.matmul %15, %5, %cst_20 {dimension_numbers = #tpu.dot_dimension_numbers<[2], [1], [1], [2], [0, 0, 0, 1, 1, 2], [0], [0]>} : vector<4x8x8xf32>, vector<4x8x32xf32>, vector<4x8x32xf32> -> vector<4x8x32xf32>
    "tpu.trace_stop"() : () -> ()
    %c0_21 = arith.constant 0 : index
    %c0_22 = arith.constant 0 : index
    %c0_23 = arith.constant 0 : index
    %23 = vector.load %arg9[%c0_21, %c0_22, %c0_23] : memref<4x8x32xf32, #tpu.memory_space<vmem>>, vector<4x8x32xf32>
    %24 = vector.broadcast %12 : vector<4x8x1xf32> to vector<4x8x32xf32>
    %25 = arith.mulf %24, %23 : vector<4x8x32xf32>
    %26 = arith.addf %25, %22 : vector<4x8x32xf32>
    %c0_24 = arith.constant 0 : index
    %c0_25 = arith.constant 0 : index
    %c0_26 = arith.constant 0 : index
    %27 = vector.load %arg9[%c0_24, %c0_25, %c0_26] : memref<4x8x32xf32, #tpu.memory_space<vmem>>, vector<4x8x32xf32>
    tpu.vector_store %arg9[%c0_24, %c0_25, %c0_26], %26 {strides = array<i32>} : memref<4x8x32xf32, #tpu.memory_space<vmem>>, vector<4x8x32xf32>,
    %c0_27 = arith.constant 0 : index
    %c0_28 = arith.constant 0 : index
    %c0_29 = arith.constant 0 : index
    %28 = vector.load %arg7[%c0_27, %c0_28, %c0_29] : memref<4x8x1xf32, #tpu.memory_space<vmem>>, vector<4x8x1xf32>
    tpu.vector_store %arg7[%c0_27, %c0_28, %c0_29], %10 {strides = array<i32>} : memref<4x8x1xf32, #tpu.memory_space<vmem>>, vector<4x8x1xf32>,
    %c0_i32_30 = arith.constant 0 : i32
    %29 = arith.cmpi eq, %arg2, %c0_i32_30 : i32
    %30 = arith.extui %29 : i1 to i32
    %c0_i32_31 = arith.constant 0 : i32
    %31 = arith.cmpi ne, %30, %c0_i32_31 : i32
    scf.if %31 {
      %c0_32 = arith.constant 0 : index
      %c0_33 = arith.constant 0 : index
      %c0_34 = arith.constant 0 : index
      %32 = vector.load %arg8[%c0_32, %c0_33, %c0_34] : memref<4x8x1xf32, #tpu.memory_space<vmem>>, vector<4x8x1xf32>
      %33 = tpu.reciprocal %32 : vector<4x8x1xf32> -> vector<4x8x1xf32>
      %c0_35 = arith.constant 0 : index
      %c0_36 = arith.constant 0 : index
      %c0_37 = arith.constant 0 : index
      %34 = vector.load %arg9[%c0_35, %c0_36, %c0_37] : memref<4x8x32xf32, #tpu.memory_space<vmem>>, vector<4x8x32xf32>
      %35 = vector.broadcast %33 : vector<4x8x1xf32> to vector<4x8x32xf32>
      %36 = arith.mulf %34, %35 : vector<4x8x32xf32>
      %c0_38 = arith.constant 0 : index
      %c0_39 = arith.constant 0 : index
      %c0_40 = arith.constant 0 : index
      %37 = vector.load %arg6[%c0_38, %c0_39, %c0_40] : memref<4x8x32xf32, #tpu.memory_space<vmem>>, vector<4x8x32xf32>
      tpu.vector_store %arg6[%c0_38, %c0_39, %c0_40], %36 {strides = array<i32>} : memref<4x8x32xf32, #tpu.memory_space<vmem>>, vector<4x8x32xf32>,
    } else {
    }
    return
  }
  func.func @transform_0(%arg0: i32, %arg1: i32, %arg2: i32) -> (i32, i32, i32) {
    %c0_i32 = arith.constant 0 : i32
    %c0_i32_0 = arith.constant 0 : i32
    return %arg0, %arg1, %c0_i32 : i32, i32, i32
  }
  func.func @transform_1(%arg0: i32, %arg1: i32, %arg2: i32) -> (i32, i32, i32) {
    %c0_i32 = arith.constant 0 : i32
    %c0_i32_0 = arith.constant 0 : i32
    return %arg0, %arg2, %c0_i32 : i32, i32, i32
  }
  func.func @transform_2(%arg0: i32, %arg1: i32, %arg2: i32) -> (i32, i32, i32) {
    %c0_i32 = arith.constant 0 : i32
    %c0_i32_0 = arith.constant 0 : i32
    return %arg0, %arg2, %c0_i32 : i32, i32, i32
  }
  func.func @transform_3(%arg0: i32, %arg1: i32, %arg2: i32) -> (i32, i32, i32) {
    %c0_i32 = arith.constant 0 : i32
    %c0_i32_0 = arith.constant 0 : i32
    return %arg0, %arg1, %c0_i32 : i32, i32, i32
  }
}

</mosaic_0001>

<bundles_post_ra>
// kernel: tpu_custom_call.1
= control target key start
LH: loop header
LB: loop body
LE: loop exit
PB: predicated region body
PF: predicated region fallthrough
CT: control target
= control target key end

     0   :  { %8 = vsyncpa [#allocation7], 0  ;;  %s1231_s0 = inlined_call_operand.hbm [shape: f32[4,8,32], index: 0, kind: input, shape index: {}]   ;;  %s1232_s1 = inlined_call_operand.hbm [shape: f32[4,8,32], index: 1, kind: input, shape index: {}]   ;;  %s1233_s2 = inlined_call_operand.hbm [shape: f32[4,8,32], index: 2, kind: input, shape index: {}]   ;;  %s1234_s3 = inlined_call_operand.hbm [shape: f32[4,8,32], index: 3, kind: output, shape index: {}]  }
   0x1   :  { %9 = vsyncpa [#allocation10], 0 }
   0x2   :  { %10 = vsyncpa [#allocation8], 0  ;;  %s1080_s12 = smov [#allocation9]   ;;  %s1081_s14 = smov [#allocation6]  }
   0x3   :  { %s28_s13 = sshll.u32 %s1080_s12, 4  ;;  %s16_s15 = sshll.u32 %s1081_s14, 4  ;;  %s29_s13 = int_to_ptr.vmem [resolvable:$true] %s28_s13  ;;  %s17_s15 = int_to_ptr.vmem [resolvable:$true] %s16_s15 }
   0x4   :  { %s1002_s16 = scalar_lea.vmem %s29_s13, 512  ;;  %p1007_p1 = scmp.lt.s32.totalorder %s29_s13, %s29_s13 }
   0x5   :  { %p1003_p0 = scmp.ne.s32.totalorder %s29_s13, %s1002_s16  ;;  %p1008_p2 = scmp.lt.s32.totalorder %s1002_s16, %s1002_s16 }
   0x7   :  { %p1009_p3 = por %p1008_p2, %p1007_p1 }
   0x9   :  { %p1010_p4 = pnand %p1009_p3, %p1003_p0 }
   0xb   :  { %1013 = shalt.err (!%p1010_p4)
}
   0xc   :  { %s1082_s17 = smov 128   ;;  %s1083_s18 = smov 8  }
   0xd   :  { %34 = dma.hbm_to_vmem [thread:$0]  %s1232_s1, 512, %s29_s13, [#allocation10], %s1082_s17, %s1082_s17, %s1083_s18  }
   0xe   :  { %s1022_s21 = scalar_lea.vmem %s17_s15, 512  ;;  %p1027_p6 = scmp.lt.s32.totalorder %s17_s15, %s17_s15 }
   0xf   :  { %p1023_p5 = scmp.ne.s32.totalorder %s17_s15, %s1022_s21  ;;  %p1028_p7 = scmp.lt.s32.totalorder %s1022_s21, %s1022_s21 }
  0x11   :  { %p1029_p8 = por %p1028_p7, %p1027_p6 }
  0x13   :  { %p1030_p9 = pnand %p1029_p8, %p1023_p5 }
  0x15   :  { %1033 = shalt.err (!%p1030_p9)
}
  0x16   :  { %22 = dma.hbm_to_vmem [thread:$0]  %s1231_s0, 512, %s17_s15, [#allocation7], %s1082_s17, %s1082_s17, %s1083_s18  }
  0x17   :  { %s1084_s24 = smov [#allocation11]  }
  0x18   :  { %s40_s25 = sshll.u32 %s1084_s24, 4  ;;  %s41_s25 = int_to_ptr.vmem [resolvable:$true] %s40_s25 }
  0x19   :  { %s1042_s26 = scalar_lea.vmem %s41_s25, 512  ;;  %p1047_p11 = scmp.lt.s32.totalorder %s41_s25, %s41_s25 }
  0x1a   :  { %p1043_p10 = scmp.ne.s32.totalorder %s41_s25, %s1042_s26  ;;  %p1048_p12 = scmp.lt.s32.totalorder %s1042_s26, %s1042_s26 }
  0x1c   :  { %p1049_p13 = por %p1048_p12, %p1047_p11 }
  0x1e   :  { %p1050_p0 = pnand %p1049_p13, %p1043_p10 }
  0x20   :  { %1053 = shalt.err (!%p1050_p0)
}
  0x21   :  { %46 = dma.hbm_to_vmem [thread:$0]  %s1233_s2, 512, %s41_s25, [#allocation10], %s1082_s17, %s1082_s17, %s1083_s18  }
  0x22   :  { %1074 = dma.done.wait [#allocation7], 512  }
  0x23   :  { %1075 = vsyncadd [#allocation7], 4294966784 }
  0x24   :  { %1076 = dma.done.wait [#allocation10], 1024  }
  0x25   :  { %1077 = vsyncadd [#allocation10], 4294966272  ;;  %vm69_vm0 = vcmask 261120   ;;  %v1085_v0 = vmov 0.0   ;;  %vm1086_vm1 = vmmov 0   ;;  %v90_v1 = vld [vmem:[#allocation9] sm:$0xff] }
  0x26   :  { %918 = vmatprep.subr.mxu0 %v1085_v0  ;;  %70 = vst.msk [vmem:[#allocation4] sm:$0xff] %vm69_vm0, %v1085_v0  ;;  %71 = vst.msk [vmem:[#allocation4 + $0x8] sm:$0xff] %vm69_vm0, %v1085_v0  ;;  %923 = vmatprep.subr.mxu1 %v1085_v0  ;;  %v91_v2 = vld [vmem:[#allocation9 + $0x8] sm:$0xff]  ;;  %v74_v3 = vld [vmem:[#allocation6] sm:$0xff]  ;;  %vm60_vm2 = vcmask 7168   ;;  %v1087_v17 = vmov -inf  }
  0x27   :  { %72 = vst.msk [vmem:[#allocation4 + $0x10] sm:$0xff] %vm69_vm0, %v1085_v0  ;;  %73 = vst.msk [vmem:[#allocation4 + $0x18] sm:$0xff] %vm69_vm0, %v1085_v0  ;;  %920 = vmatprep.mubr.msk.f32.mxu0 %vm1086_vm1, %v1085_v0  ;;  %925 = vmatprep.mubr.msk.f32.mxu1 %vm1086_vm1, %v1085_v0  ;;  %v78_v4 = vmul.f32 0.17677669, %v74_v3  ;;  %v75_v5 = vld [vmem:[#allocation6 + $0x8] sm:$0xff]  ;;  %v76_v6 = vld [vmem:[#allocation6 + $0x10] sm:$0xff] }
  0x28   :  { %919 = vmatpush3.xpose.msk.msra.mxu0 %vm69_vm0, %v90_v1  ;;  %924 = vmatpush3.xpose.msk.msra.mxu1 %vm69_vm0, %v91_v2  ;;  %v79_v7 = vmul.f32 0.17677669, %v75_v5  ;;  %v80_v8 = vmul.f32 0.17677669, %v76_v6  ;;  %v77_v9 = vld [vmem:[#allocation6 + $0x18] sm:$0xff]  ;;  %v92_v11 = vld [vmem:[#allocation9 + $0x10] sm:$0xff] }
  0x29   :  { %928 = vmatprep.subr.mxu0 %v1085_v0  ;;  %933 = vmatprep.subr.mxu1 %v1085_v0  ;;  %82 = vst.msk [vmem:[#allocation5] sm:$0xff] %vm69_vm0, %v78_v4  ;;  %v81_v10 = vmul.f32 0.17677669, %v77_v9  ;;  %v93_v13 = vld [vmem:[#allocation9 + $0x18] sm:$0xff]  ;;  %vm407_vm3 = vcmask 64512   ;;  %v1088_v30 = vmov 0  }
  0x2a   :  { %83 = vst.msk [vmem:[#allocation5 + $0x8] sm:$0xff] %vm69_vm0, %v79_v7  ;;  %84 = vst.msk [vmem:[#allocation5 + $0x10] sm:$0xff] %vm69_vm0, %v80_v8  ;;  %968 = vset.pattern.permute.xlu0 %v1088_v30  ;;  %969 = vset.pattern.permute.xlu1 %v1088_v30  ;;  %v94_v47 = vld [vmem:[#allocation11] sm:$0xff]  ;;  %v95_v48 = vld [vmem:[#allocation11 + $0x8] sm:$0xff]  ;;  %s1089_s0 = smov [#allocation12]  }
  0x2b   :  { %85 = vst.msk [vmem:[#allocation5 + $0x18] sm:$0xff] %vm69_vm0, %v81_v10  ;;  %v96_v61 = vld [vmem:[#allocation11 + $0x10] sm:$0xff]  ;;  %v97_v1 = vld [vmem:[#allocation11 + $0x18] sm:$0xff]  ;;  %s877_s2 = sshll.u32 %s1089_s0, 4  ;;  %s878_s2 = int_to_ptr.vmem [resolvable:$true] %s877_s2 }
  0x2c   :  { %61 = vst.msk [vmem:[#allocation2] sm:$0xff] %vm60_vm2, %v1087_v17  ;;  %62 = vst.msk [vmem:[#allocation2 + $0x8] sm:$0xff] %vm60_vm2, %v1087_v17  ;;  %s1054_s28 = scalar_lea.vmem %s878_s2, 512  ;;  %p1059_p2 = scmp.lt.s32.totalorder %s878_s2, %s878_s2 }
  0x2d   :  { %63 = vst.msk [vmem:[#allocation2 + $0x10] sm:$0xff] %vm60_vm2, %v1087_v17  ;;  %64 = vst.msk [vmem:[#allocation2 + $0x18] sm:$0xff] %vm60_vm2, %v1087_v17  ;;  %p1055_p1 = scmp.ne.s32.totalorder %s878_s2, %s1054_s28  ;;  %p1060_p3 = scmp.lt.s32.totalorder %s1054_s28, %s1054_s28 }
  0x2e   :  { %65 = vst.msk [vmem:[#allocation3] sm:$0xff] %vm60_vm2, %v1085_v0  ;;  %66 = vst.msk [vmem:[#allocation3 + $0x8] sm:$0xff] %vm60_vm2, %v1085_v0 }
  0x2f   :  { %67 = vst.msk [vmem:[#allocation3 + $0x10] sm:$0xff] %vm60_vm2, %v1085_v0  ;;  %68 = vst.msk [vmem:[#allocation3 + $0x18] sm:$0xff] %vm60_vm2, %v1085_v0  ;;  %p1061_p4 = por %p1060_p3, %p1059_p2 }
  0x30   :  { %v86_v12 = vld [vmem:[#allocation5] sm:$0xff] }
  0x31   :  { %921 = vmatmul.mubr.msk.f32.vlgmr.msra.gmra.mxu0 %vm69_vm0, %v86_v12  ;;  %v87_v14 = vld [vmem:[#allocation5 + $0x8] sm:$0xff]  ;;  %v88_v15 = vld [vmem:[#allocation5 + $0x10] sm:$0xff]  ;;  %p1062_p5 = pnand %p1061_p4, %p1055_p1 }
  0x32   :  { %926 = vmatmul.mubr.msk.f32.vlgmr.msra.gmra.mxu1 %vm69_vm0, %v87_v14  ;;  %929 = vmatpush3.xpose.msk.msra.mxu0 %vm69_vm0, %v92_v11  ;;  %v89_v16 = vld [vmem:[#allocation5 + $0x18] sm:$0xff] }
  0x33   :  { %930 = vmatprep.mubr.msk.f32.mxu0 %vm1086_vm1, %v1085_v0  ;;  %934 = vmatpush3.xpose.msk.msra.mxu1 %vm69_vm0, %v93_v13  ;;  %v1182_v31 = vld [vmem:[#allocation2] sm:$0xff]  ;;  %v404_v34 = vld [vmem:[#allocation2 + $0x8] sm:$0xff] }
  0x34   :  { %935 = vmatprep.mubr.msk.f32.mxu1 %vm1086_vm1, %v1085_v0  ;;  %938 = vmatprep.subr.mxu0 %v1085_v0  ;;  %v1187_v35 = vld [vmem:[#allocation2 + $0x10] sm:$0xff]  ;;  %v406_v41 = vld [vmem:[#allocation2 + $0x18] sm:$0xff] }
  0x35   :  { %931 = vmatmul.mubr.msk.f32.vlgmr.msra.gmra.mxu0 %vm69_vm0, %v88_v15  ;;  %943 = vmatprep.subr.mxu1 %v1085_v0  ;;  %v468_v15 = vld [vmem:[#allocation3] sm:$0xff] }
  0x36   :  { %936 = vmatmul.mubr.msk.f32.vlgmr.msra.gmra.mxu1 %vm69_vm0, %v89_v16  ;;  %940 = vmatprep.mubr.msk.f32.mxu0 %vm1086_vm1, %v1085_v0 }
  0x37   :  { %945 = vmatprep.mubr.msk.f32.mxu1 %vm1086_vm1, %v1085_v0  ;;  %939 = vmatpush3.msra.mxu0 %v94_v47 }
  0x38   :  { %948 = vmatprep.subr.mxu0 %v1085_v0  ;;  %944 = vmatpush3.msra.mxu1 %v95_v48 }
  0x39   :  { %953 = vmatprep.subr.mxu1 %v1085_v0 }
  0xf1   :  { %v171_v18 = vpop.f32.mrf.mxu0 }
  0xf2   :  { %v247_v19 = vpop.f32.mrf.mxu1  ;;  %v408_v20 = vsel %vm407_vm3, %v171_v18, -inf }
  0xf3   :  { %409 = vmax.xlane.f32.xlu0 %v408_v20  ;;  %v922_v21 = vpop.f32.mrf.mxu0  ;;  %v411_v23 = vsel %vm407_vm3, %v247_v19, -inf }
  0xf4   :  { %v927_v22 = vpop.f32.mrf.mxu1 }
  0xf5   :  { %v323_v24 = vpop.f32.mrf.mxu0  ;;  %v470_v22 = vld [vmem:[#allocation3 + $0x10] sm:$0xff] }
  0xf6   :  { %v399_v25 = vpop.f32.mrf.mxu1  ;;  %v414_v26 = vsel %vm407_vm3, %v323_v24, -inf }
  0xf7   :  { %412 = vmax.xlane.f32.xlu0 %v411_v23  ;;  %v932_v27 = vpop.f32.mrf.mxu0  ;;  %415 = vmax.xlane.f32.xlu1 %v414_v26  ;;  %v417_v29 = vsel %vm407_vm3, %v399_v25, -inf  ;;  %v471_v26 = vld [vmem:[#allocation3 + $0x18] sm:$0xff] }
  0xf8   :  { %v937_v28 = vpop.f32.mrf.mxu1 }
  0xfb   :  { %418 = vmax.xlane.f32.xlu1 %v417_v29 }
 0x17c   :  { %v410_v32 = vpop.xlane.xlu0 %409 }
 0x17d   :  { %v1185_v33 = vmax.f32 %v1182_v31, %v410_v32 }
 0x17f   :  { %v424_v36 = vsub.f32 %v1182_v31, %v1185_v33  ;;  %825 = vst.msk [vmem:[#allocation2] sm:$0xff] %vm60_vm2, %v1185_v33  ;;  %438 = vperm.xlu0 %968, %v1185_v33  }
 0x180   :  { %v413_v37 = vpop.xlane.xlu0 %412  ;;  %v416_v38 = vpop.xlane.xlu1 %415 }
 0x181   :  { %v421_v39 = vmax.f32 %v404_v34, %v413_v37  ;;  %v422_v40 = vmax.f32 %v1187_v35, %v416_v38  ;;  %v428_v8 = vmul.f32 1.442695, %v424_v36 }
 0x183   :  { %v425_v42 = vsub.f32 %v404_v34, %v421_v39  ;;  %826 = vst.msk [vmem:[#allocation2 + $0x8] sm:$0xff] %vm60_vm2, %v421_v39  ;;  %443 = vperm.xlu1 %969, %v421_v39   ;;  %v426_v43 = vsub.f32 %v1187_v35, %v422_v40  ;;  %827 = vst.msk [vmem:[#allocation2 + $0x10] sm:$0xff] %vm60_vm2, %v422_v40  ;;  %v789_v39 = vld [vmem:[#allocation4] sm:$0xff] }
 0x184   :  { %v419_v44 = vpop.xlane.xlu1 %418 }
 0x185   :  { %v423_v45 = vmax.f32 %v406_v41, %v419_v44  ;;  %v430_v6 = vmul.f32 1.442695, %v425_v42  ;;  %v432_v10 = vmul.f32 1.442695, %v426_v43  ;;  %v790_v42 = vld [vmem:[#allocation4 + $0x8] sm:$0xff] }
 0x187   :  { %448 = vperm.xlu1 %969, %v422_v40   ;;  %v427_v46 = vsub.f32 %v406_v41, %v423_v45  ;;  %828 = vst.msk [vmem:[#allocation2 + $0x18] sm:$0xff] %vm60_vm2, %v423_v45 }
 0x189   :  { %v434_v11 = vmul.f32 1.442695, %v427_v46 }
 0x18b   :  { %453 = vperm.xlu1 %969, %v423_v45  }
 0x1fa   :  { %v439_v49 = vpop.permute.xlu0 %438 }
 0x1fb   :  { %v456_v50 = vsub.f32 %v171_v18, %v439_v49  ;;  %v469_v18 = vld [vmem:[#allocation3 + $0x8] sm:$0xff]  ;;  %v791_v49 = vld [vmem:[#allocation4 + $0x10] sm:$0xff] }
 0x1fd   :  { %v460_v51 = vmul.f32 1.442695, %v456_v50 }
 0x1fe   :  { %v444_v52 = vpop.permute.xlu1 %443 }
 0x1ff   :  { %970 = vpow2.f32 %v460_v51  ;;  %v457_v53 = vsub.f32 %v247_v19, %v444_v52 }
 0x201   :  { %v462_v54 = vmul.f32 1.442695, %v457_v53 }
 0x202   :  { %v449_v55 = vpop.permute.xlu1 %448 }
 0x203   :  { %972 = vpow2.f32 %v462_v54  ;;  %v458_v56 = vsub.f32 %v323_v24, %v449_v55  ;;  %v792_v54 = vld [vmem:[#allocation4 + $0x18] sm:$0xff] }
 0x205   :  { %v464_v57 = vmul.f32 1.442695, %v458_v56 }
 0x206   :  { %v454_v58 = vpop.permute.xlu1 %453 }
 0x207   :  { %974 = vpow2.f32 %v464_v57  ;;  %v459_v59 = vsub.f32 %v399_v25, %v454_v58 }
 0x209   :  { %v466_v60 = vmul.f32 1.442695, %v459_v59 }
 0x20b   :  { %976 = vpow2.f32 %v466_v60 }
 0x20c   :  { %v971_v62 = vpop.eup %970  ;;  %978 = vpow2.f32 %v430_v6 }
 0x20d   :  { %941 = vmatmul.mubr.msk.f32.vlgmr.msra.gmra.mxu0 %vm407_vm3, %v971_v62  ;;  %v476_v63 = vsel %vm407_vm3, %v971_v62, 0.0  ;;  %980 = vpow2.f32 %v428_v8 }
 0x20e   :  { %477 = vadd.xlane.f32.xlu1 %v476_v63  ;;  %949 = vmatpush3.msra.mxu0 %v96_v61  ;;  %982 = vpow2.f32 %v432_v10 }
 0x20f   :  { %950 = vmatprep.mubr.msk.f32.mxu0 %vm1086_vm1, %v1085_v0  ;;  %984 = vpow2.f32 %v434_v11 }
 0x210   :  { %v973_v2 = vpop.eup %972 }
 0x211   :  { %946 = vmatmul.mubr.msk.f32.vlgmr.msra.gmra.mxu1 %vm407_vm3, %v973_v2  ;;  %v479_v3 = vsel %vm407_vm3, %v973_v2, 0.0 }
 0x212   :  { %480 = vadd.xlane.f32.xlu0 %v479_v3  ;;  %954 = vmatpush3.msra.mxu1 %v97_v1 }
 0x213   :  { %955 = vmatprep.mubr.msk.f32.mxu1 %vm1086_vm1, %v1085_v0 }
 0x214   :  { %v975_v4 = vpop.eup %974 }
 0x215   :  { %951 = vmatmul.mubr.msk.f32.vlgmr.msra.gmra.mxu0 %vm407_vm3, %v975_v4  ;;  %v482_v5 = vsel %vm407_vm3, %v975_v4, 0.0 }
 0x216   :  { %483 = vadd.xlane.f32.xlu1 %v482_v5 }
 0x218   :  { %v977_v7 = vpop.eup %976 }
 0x219   :  { %956 = vmatmul.mubr.msk.f32.vlgmr.msra.gmra.mxu1 %vm407_vm3, %v977_v7  ;;  %v485_v9 = vsel %vm407_vm3, %v977_v7, 0.0  ;;  %v979_v0 = vpop.eup %978 }
 0x21a   :  { %486 = vadd.xlane.f32.xlu1 %v485_v9  ;;  %v981_v12 = vpop.eup %980  ;;  %v473_v20 = vmul.f32 %v979_v0, %v469_v18 }
 0x21b   :  { %v983_v13 = vpop.eup %982  ;;  %v472_v16 = vmul.f32 %v981_v12, %v468_v15 }
 0x21c   :  { %v985_v14 = vpop.eup %984  ;;  %v474_v24 = vmul.f32 %v983_v13, %v470_v22 }
 0x21d   :  { %v475_v29 = vmul.f32 %v985_v14, %v471_v26 }
 0x228   :  { %800 = vperm.xlu0 %968, %v979_v0  }
 0x22b   :  { %795 = vperm.xlu1 %969, %v981_v12  }
 0x22f   :  { %805 = vperm.xlu1 %969, %v983_v13  }
 0x233   :  { %810 = vperm.xlu1 %969, %v985_v14  }
 0x297   :  { %v478_v17 = vpop.xlane.xlu1 %477 }
 0x298   :  { %v488_v19 = vadd.f32 %v478_v17, %v472_v16 }
 0x29a   :  { %493 = vst.msk [vmem:[#allocation3] sm:$0xff] %vm60_vm2, %v488_v19 }
 0x29b   :  { %v481_v21 = vpop.xlane.xlu0 %480 }
 0x29c   :  { %v489_v23 = vadd.f32 %v481_v21, %v473_v20 }
 0x29e   :  { %494 = vst.msk [vmem:[#allocation3 + $0x8] sm:$0xff] %vm60_vm2, %v489_v23 }
 0x29f   :  { %v484_v25 = vpop.xlane.xlu1 %483 }
 0x2a0   :  { %v490_v27 = vadd.f32 %v484_v25, %v474_v24 }
 0x2a1   :  { %v832_v28 = vld [vmem:[#allocation3] sm:$0xff] }
 0x2a2   :  { %495 = vst.msk [vmem:[#allocation3 + $0x10] sm:$0xff] %vm60_vm2, %v490_v27  ;;  %986 = vrcp.f32 %v832_v28 }
 0x2a3   :  { %v487_v30 = vpop.xlane.xlu1 %486  ;;  %v801_v43 = vpop.permute.xlu0 %800 }
 0x2a4   :  { %v491_v31 = vadd.f32 %v487_v30, %v475_v29  ;;  %v814_v48 = vmul.f32 %v801_v43, %v790_v42 }
 0x2a5   :  { %v833_v32 = vld [vmem:[#allocation3 + $0x8] sm:$0xff] }
 0x2a6   :  { %496 = vst.msk [vmem:[#allocation3 + $0x18] sm:$0xff] %vm60_vm2, %v491_v31  ;;  %988 = vrcp.f32 %v833_v32 }
 0x2a7   :  { %v796_v40 = vpop.permute.xlu1 %795 }
 0x2a8   :  { %v813_v41 = vmul.f32 %v796_v40, %v789_v39 }
 0x2a9   :  { %v834_v33 = vld [vmem:[#allocation3 + $0x10] sm:$0xff] }
 0x2aa   :  { %990 = vrcp.f32 %v834_v33 }
 0x2ab   :  { %v806_v46 = vpop.permute.xlu1 %805 }
 0x2ac   :  { %v815_v53 = vmul.f32 %v806_v46, %v791_v49 }
 0x2ad   :  { %v835_v34 = vld [vmem:[#allocation3 + $0x18] sm:$0xff] }
 0x2ae   :  { %992 = vrcp.f32 %v835_v34 }
 0x2af   :  { %v987_v35 = vpop.eup %986  ;;  %v811_v55 = vpop.permute.xlu1 %810 }
 0x2b0   :  { %846 = vperm.xlu1 %969, %v987_v35   ;;  %v816_v59 = vmul.f32 %v811_v55, %v792_v54 }
 0x2b3   :  { %v989_v36 = vpop.eup %988 }
 0x2b4   :  { %851 = vperm.xlu0 %968, %v989_v36  }
 0x2b7   :  { %v991_v37 = vpop.eup %990 }
 0x2b8   :  { %856 = vperm.xlu1 %969, %v991_v37  }
 0x2bb   :  { %v993_v38 = vpop.eup %992 }
 0x2bc   :  { %861 = vperm.xlu0 %968, %v993_v38  }
 0x2cd   :  { %v566_v44 = vpop.f32.mrf.mxu0 }
 0x2ce   :  { %v817_v45 = vadd.f32 %v813_v41, %v566_v44 }
 0x2cf   :  { %v942_v47 = vpop.f32.mrf.mxu0 }
 0x2d0   :  { %821 = vst.msk [vmem:[#allocation4] sm:$0xff] %vm69_vm0, %v817_v45 }
 0x2d1   :  { %v639_v50 = vpop.f32.mrf.mxu1 }
 0x2d2   :  { %v818_v51 = vadd.f32 %v814_v48, %v639_v50 }
 0x2d3   :  { %v947_v52 = vpop.f32.mrf.mxu1 }
 0x2d4   :  { %822 = vst.msk [vmem:[#allocation4 + $0x8] sm:$0xff] %vm69_vm0, %v818_v51 }
 0x2d5   :  { %v712_v56 = vpop.f32.mrf.mxu0 }
 0x2d6   :  { %v819_v57 = vadd.f32 %v815_v53, %v712_v56 }
 0x2d7   :  { %v952_v58 = vpop.f32.mrf.mxu0  ;;  %v840_v63 = vld [vmem:[#allocation4] sm:$0xff] }
 0x2d8   :  { %823 = vst.msk [vmem:[#allocation4 + $0x10] sm:$0xff] %vm69_vm0, %v819_v57 }
 0x2d9   :  { %v785_v60 = vpop.f32.mrf.mxu1 }
 0x2da   :  { %v820_v61 = vadd.f32 %v816_v59, %v785_v60 }
 0x2db   :  { %v957_v62 = vpop.f32.mrf.mxu1  ;;  %v841_v3 = vld [vmem:[#allocation4 + $0x8] sm:$0xff] }
 0x2dc   :  { %824 = vst.msk [vmem:[#allocation4 + $0x18] sm:$0xff] %vm69_vm0, %v820_v61 }
 0x2df   :  { %v842_v6 = vld [vmem:[#allocation4 + $0x10] sm:$0xff] }
 0x2e3   :  { %v843_v10 = vld [vmem:[#allocation4 + $0x18] sm:$0xff] }
 0x32b   :  { %v847_v1 = vpop.permute.xlu1 %846 }
 0x32c   :  { %v864_v2 = vmul.f32 %v847_v1, %v840_v63 }
 0x32e   :  { %868 = vst.msk [vmem:[#allocation12] sm:$0xff] %vm69_vm0, %v864_v2 }
 0x32f   :  { %v852_v4 = vpop.permute.xlu0 %851 }
 0x330   :  { %v865_v5 = vmul.f32 %v852_v4, %v841_v3 }
 0x332   :  { %869 = vst.msk [vmem:[#allocation12 + $0x8] sm:$0xff] %vm69_vm0, %v865_v5 }
 0x333   :  { %v857_v7 = vpop.permute.xlu1 %856 }
 0x334   :  { %v866_v8 = vmul.f32 %v857_v7, %v842_v6 }
 0x336   :  { %870 = vst.msk [vmem:[#allocation12 + $0x10] sm:$0xff] %vm69_vm0, %v866_v8 }
 0x337   :  { %v862_v9 = vpop.permute.xlu0 %861 }
 0x338   :  { %v867_v11 = vmul.f32 %v862_v9, %v843_v10 }
 0x33a   :  { %871 = vst.msk [vmem:[#allocation12 + $0x18] sm:$0xff] %vm69_vm0, %v867_v11 }
 0x33b   :  { %1065 = shalt.err (!%p1062_p5)
}
 0x33c   :  { %883 = dma.vmem_to_hbm [thread:$0]  %s878_s2, 512, %s1234_s3, [#allocation8], %s1082_s17, %s1082_s17, %s1083_s18  }
 0x33d   :  { %1078 = dma.done.wait [#allocation8], 512  }
 0x33e   :  { %1079 = vsyncadd [#allocation8], 4294966784 }
 0x33f   :  { %887 = vsyncpa [#allocation7], 1 }
 0x340   :  { %888 = vsyncpa [#allocation10], 1 }
 0x341   :  { %889 = vsyncpa [#allocation8], 1 }

</bundles_post_ra>
